<compile_context>
chip_gen: v7x
topology: tpu7x:2x2x1
jax: 0.10.0
libtpu: 0.0.40
codegen_flags: <defaults>
</compile_context>

<pallas_src>
import jax
import jax.numpy as jnp
from jax.experimental import pallas as pl
from jax.experimental.pallas import tpu as pltpu

_LANE_W = 512  # lane-dense last dim (multiple of 128 -> unmasked full-width vst)


def _asinh_kernel(x_ref, o_ref):
    # asinh(x) = sign(x) * log(|x| + sqrt(x^2 + 1))
    #   - sqrt(y) as y * rsqrt(y) (y >= 1): one EUP push instead of a possible
    #     rsqrt+recip pair; log is the second (and last) EUP push.
    #   - |x| > 1e18: x*x overflows f32, but there sqrt(x^2+1) == |x| exactly,
    #     so substitute |x| (a VPU select, no extra EUP op).
    #   - |x| < 1e-4: asinh(x) ~= x to better than f32 eps; avoids the
    #     log(1 + tiny) relative-precision collapse.
    #   - sign (including -0.0) re-attached by copying the IEEE sign bit.
    x = x_ref[...].astype(jnp.float32)
    a = jnp.abs(x)
    y = a * a + 1.0
    s = y * jax.lax.rsqrt(y)              # sqrt(x^2 + 1); 1 EUP push
    s = jnp.where(a > 1.0e18, a, s)       # overflow guard (also masks inf*0 NaN)
    res = jnp.log(a + s)                  # 1 EUP push
    res = jnp.where(a < 1.0e-4, a, res)   # small-|x| relative precision

    # Transfer x's sign bit onto the (non-negative) magnitude.
    sign_mask = jnp.uint32(0x80000000)
    xb = pltpu.bitcast(x, jnp.uint32)
    rb = pltpu.bitcast(res, jnp.uint32)
    res = pltpu.bitcast(rb | (xb & sign_mask), jnp.float32)

    o_ref[...] = res.astype(o_ref.dtype)


def _pick_tiling():
    """Per-generation (tile_rows, vmem_limit_bytes)."""
    kind = ""
    try:
        kind = jax.devices()[0].device_kind.lower()
    except Exception:
        pass
    if ("v6" in kind) or ("v7" in kind) or ("7x" in kind):
        # 4 MiB f32 blocks, 16 MiB double-buffered in+out; fits under 32 MiB.
        return 2048, 32 << 20
    # v5e (16 MiB scoped-VMEM default) and unknown chips: 2 MiB blocks.
    return 1024, None


def _asinh_slab(slab, tile_rows, vmem_limit):
    """Run the Pallas kernel on a lane-dense (rows, _LANE_W) slab."""
    rows = slab.shape[0]
    tile = tile_rows if rows > tile_rows else rows  # full-dim block if small
    grid = (pl.cdiv(rows, tile),)

    n = rows * _LANE_W
    itemsize = jnp.dtype(slab.dtype).itemsize
    cost = pl.CostEstimate(
        flops=12 * n,            # abs/mul/add/selects/bit-ops (approx)
        transcendentals=2 * n,   # rsqrt + log per element
        bytes_accessed=2 * n * itemsize,
    )

    cp_kwargs = dict(dimension_semantics=("parallel",))
    if vmem_limit is not None:
        cp_kwargs["vmem_limit_bytes"] = vmem_limit

    return pl.pallas_call(
        _asinh_kernel,
        out_shape=jax.ShapeDtypeStruct((rows, _LANE_W), slab.dtype),
        grid_spec=pltpu.PrefetchScalarGridSpec(
            num_scalar_prefetch=0,
            grid=grid,
            in_specs=[pl.BlockSpec((tile, _LANE_W), lambda i: (i, 0))],
            out_specs=pl.BlockSpec((tile, _LANE_W), lambda i: (i, 0)),
        ),
        compiler_params=pltpu.CompilerParams(**cp_kwargs),
        cost_estimate=cost,
    )(slab)


def asinh_pallas(x):
    """Elementwise asinh for an NCHW (or any-shape) float array."""
    orig_shape = x.shape
    orig_dtype = x.dtype

    flat = x.reshape(-1)
    n = flat.shape[0]
    if n == 0:
        return x

    tile_rows, vmem_limit = _pick_tiling()
    n_bulk = (n // _LANE_W) * _LANE_W

    if n_bulk == n:
        # Fast path: element count is lane-aligned, pure reshape, no copies.
        out = _asinh_slab(flat.reshape(-1, _LANE_W), tile_rows, vmem_limit)
        return out.reshape(orig_shape)

    # Misaligned tail (< _LANE_W elements): Pallas kernel on the lane-aligned
    # bulk, tiny tail via plain XLA arcsinh; avoids the pad-concat and the
    # full-output-slice HBM round trips of the padded approach.
    parts = []
    if n_bulk > 0:
        bulk = jax.lax.slice(flat, (0,), (n_bulk,)).reshape(-1, _LANE_W)
        parts.append(_asinh_slab(bulk, tile_rows, vmem_limit).reshape(-1))
    tail = jax.lax.slice(flat, (n_bulk,), (n,))
    parts.append(jnp.arcsinh(tail.astype(jnp.float32)).astype(orig_dtype))
    out = parts[0] if len(parts) == 1 else jnp.concatenate(parts)
    return out.reshape(orig_shape)


if __name__ == "__main__":
    key = jax.random.PRNGKey(0)
    k1, k2 = jax.random.split(key)

    # Small NCHW input (lane-aligned element count -> single-block fast path).
    x = jax.random.uniform(
        k1, (2, 4, 16, 16), dtype=jnp.float32, minval=-3.0, maxval=3.0
    )
    y = jax.block_until_ready(asinh_pallas(x))
    ref = jnp.arcsinh(x)
    assert y.shape == x.shape and y.dtype == x.dtype
    max_err = float(jnp.max(jnp.abs(y - ref)))
    assert max_err < 1e-5, f"max abs error too large: {max_err}"

    # Secondary check: misaligned element count exercises the bulk + tail path.
    x2 = jax.random.uniform(
        k2, (2, 4, 16, 17), dtype=jnp.float32, minval=-3.0, maxval=3.0
    )
    y2 = jax.block_until_ready(asinh_pallas(x2))
    max_err2 = float(jnp.max(jnp.abs(y2 - jnp.arcsinh(x2))))
    assert y2.shape == x2.shape and y2.dtype == x2.dtype
    assert max_err2 < 1e-5, f"tail-path max abs error too large: {max_err2}"

    print("KERNEL_OK")
</pallas_src>

<mosaic_0001>
module attributes {stable_mosaic.version = 11 : i64} {
  func.func @_asinh_kernel(%arg0: i32, %arg1: memref<4x512xf32, #tpu.memory_space<vmem>>, %arg2: memref<4x512xf32, #tpu.memory_space<vmem>>) attributes {dimension_semantics = [#tpu.dimension_semantics<parallel>], iteration_bounds = array<i64: 1>, scalar_prefetch = 0 : i64, scratch_operands = 0 : i64, tpu.core_type = #tpu.core_type<tc>, window_params = [{transform_indices = @transform_0, window_bounds = array<i64: 4, 512>}, {transform_indices = @transform_1, window_bounds = array<i64: 4, 512>}]} {
    %c0 = arith.constant 0 : index
    %c0_0 = arith.constant 0 : index
    %0 = vector.load %arg1[%c0, %c0_0] : memref<4x512xf32, #tpu.memory_space<vmem>>, vector<4x512xf32>
    %1 = math.absf %0 : vector<4x512xf32>
    %2 = arith.mulf %1, %1 : vector<4x512xf32>
    %cst = arith.constant 1.000000e+00 : f32
    %3 = vector.broadcast %cst : f32 to vector<4x512xf32>
    %4 = arith.addf %2, %3 : vector<4x512xf32>
    %5 = math.rsqrt %4 : vector<4x512xf32>
    %6 = arith.mulf %4, %5 : vector<4x512xf32>
    %cst_1 = arith.constant 9.99999984E+17 : f32
    %7 = vector.broadcast %cst_1 : f32 to vector<4x512xf32>
    %8 = arith.cmpf ogt, %1, %7 : vector<4x512xf32>
    %9 = arith.select %8, %1, %6 : vector<4x512xi1>, vector<4x512xf32>
    %10 = arith.addf %1, %9 : vector<4x512xf32>
    %11 = math.log %10 : vector<4x512xf32>
    %cst_2 = arith.constant 9.99999974E-5 : f32
    %12 = vector.broadcast %cst_2 : f32 to vector<4x512xf32>
    %13 = arith.cmpf olt, %1, %12 : vector<4x512xf32>
    %14 = arith.select %13, %1, %11 : vector<4x512xi1>, vector<4x512xf32>
    %15 = tpu.bitcast %0 : vector<4x512xf32> -> vector<4x512xi32>
    %16 = tpu.bitcast %14 : vector<4x512xf32> -> vector<4x512xi32>
    %c-2147483648_i32 = arith.constant -2147483648 : i32
    %17 = vector.broadcast %c-2147483648_i32 : i32 to vector<4x512xi32>
    %18 = arith.andi %15, %17 : vector<4x512xi32>
    %19 = arith.ori %16, %18 : vector<4x512xi32>
    %20 = tpu.bitcast %19 : vector<4x512xi32> -> vector<4x512xf32>
    %c0_3 = arith.constant 0 : index
    %c0_4 = arith.constant 0 : index
    %21 = vector.load %arg2[%c0_3, %c0_4] : memref<4x512xf32, #tpu.memory_space<vmem>>, vector<4x512xf32>
    tpu.vector_store %arg2[%c0_3, %c0_4], %20 {strides = array<i32>} : memref<4x512xf32, #tpu.memory_space<vmem>>, vector<4x512xf32>,
    return
  }
  func.func @transform_0(%arg0: i32) -> (i32, i32) {
    %c0_i32 = arith.constant 0 : i32
    %c0_i32_0 = arith.constant 0 : i32
    return %arg0, %c0_i32 : i32, i32
  }
  func.func @transform_1(%arg0: i32) -> (i32, i32) {
    %c0_i32 = arith.constant 0 : i32
    %c0_i32_0 = arith.constant 0 : i32
    return %arg0, %c0_i32 : i32, i32
  }
}

</mosaic_0001>

<bundles_post_ra>
// kernel: tpu_custom_call.1
= control target key start
LH: loop header
LB: loop body
LE: loop exit
PB: predicated region body
PF: predicated region fallthrough
CT: control target
= control target key end

     0   :  { %6 = vsyncpa [#allocation3], 0  ;;  %s180_s0 = inlined_call_operand.hbm [shape: f32[4,512], index: 0, kind: input, shape index: {}]   ;;  %s181_s1 = inlined_call_operand.hbm [shape: f32[4,512], index: 1, kind: output, shape index: {}]  }
   0x1   :  { %7 = vsyncpa [#allocation4], 0  ;;  %s144_s6 = smov [#allocation2]   ;;  %s96_s10 = scalar_lea.hbm %s180_s0, 256 }
   0x2   :  { %s14_s7 = sshll.u32 %s144_s6, 4  ;;  %p97_p0 = scmp.ne.s32.totalorder %s180_s0, %s96_s10  ;;  %s15_s7 = int_to_ptr.vmem [resolvable:$true] %s14_s7 }
   0x3   :  { %p100_p1 = scmp.lt.u32.totalorder %s96_s10, %s180_s0 }
   0x5   :  { %p102_p2 = pnand %p100_p1, %p97_p0 }
   0x7   :  { %105 = shalt.err (!%p102_p2)
}
   0x8   :  { %s106_s15 = scalar_lea.vmem %s15_s7, 256  ;;  %p111_p4 = scmp.lt.s32.totalorder %s15_s7, %s15_s7 }
   0x9   :  { %p107_p3 = scmp.ne.s32.totalorder %s15_s7, %s106_s15  ;;  %p112_p5 = scmp.lt.s32.totalorder %s106_s15, %s106_s15 }
   0xb   :  { %p113_p6 = por %p112_p5, %p111_p4 }
   0xd   :  { %p114_p7 = pnand %p113_p6, %p107_p3 }
   0xf   :  { %117 = shalt.err (!%p114_p7)
}
  0x10   :  { %17 = dma.hbm_to_vmem [thread:$0]  %s180_s0, 256, %s15_s7, [#allocation3]  }
  0x11   :  { %140 = dma.done.wait [#allocation3], 256  }
  0x12   :  { %141 = vsyncadd [#allocation3], 4294967040  ;;  %v21_v0 = vld [vmem:[#allocation2] sm:$0xff]  ;;  %v22_v1 = vld [vmem:[#allocation2 + $0x8] sm:$0xff]  ;;  %s145_s0 = smov [#allocation5]  }
  0x13   :  { %v23_v2 = vand.u32 2147483647, %v21_v0  ;;  %v24_v3 = vand.u32 2147483647, %v22_v1  ;;  %v49_v16 = vcombine.high %v21_v0, %v21_v0  ;;  %v50_v17 = vcombine.high %v22_v1, %v22_v1  ;;  %s75_s18 = sshll.u32 %s145_s0, 4  ;;  %s76_s18 = int_to_ptr.vmem [resolvable:$true] %s75_s18 }
  0x14   :  { %v55_v19 = vand.u32 2147483648, %v21_v0  ;;  %v57_v22 = vand.u32 2147483648, %v22_v1  ;;  %s118_s19 = scalar_lea.vmem %s76_s18, 256  ;;  %p123_p9 = scmp.lt.s32.totalorder %s76_s18, %s76_s18 }
  0x15   :  { %v25_v4 = vmul.f32 %v23_v2, %v23_v2  ;;  %v26_v5 = vmul.f32 %v24_v3, %v24_v3  ;;  %vm33_vm0 = vcmp.gt.f32.partialorder %v23_v2, 1e+18  ;;  %vm34_vm1 = vcmp.gt.f32.partialorder %v24_v3, 1e+18  ;;  %p119_p8 = scmp.ne.s32.totalorder %s76_s18, %s118_s19  ;;  %p124_p10 = scmp.lt.s32.totalorder %s118_s19, %s118_s19 }
  0x16   :  { %vm43_vm2 = vcmp.lt.f32.partialorder %v23_v2, 0.0001  ;;  %vm44_vm3 = vcmp.lt.f32.partialorder %v24_v3, 0.0001  ;;  %v56_v23 = vand.u32 2147483648, %v49_v16  ;;  %v58_v26 = vand.u32 2147483648, %v50_v17 }
  0x17   :  { %v27_v6 = vadd.f32 1.0, %v25_v4  ;;  %v28_v7 = vadd.f32 1.0, %v26_v5  ;;  %p125_p11 = por %p124_p10, %p123_p9 }
  0x19   :  { %88 = vrsqrt.f32 %v27_v6  ;;  %p126_p12 = pnand %p125_p11, %p119_p8 }
  0x1a   :  { %90 = vrsqrt.f32 %v28_v7 }
  0x23   :  { %v89_v8 = vpop.eup %88 }
  0x24   :  { %v91_v9 = vpop.eup %90  ;;  %v31_v10 = vmul.f32 %v89_v8, %v27_v6 }
  0x25   :  { %v32_v11 = vmul.f32 %v91_v9, %v28_v7 }
  0x26   :  { %v35_v12 = vsel %vm33_vm0, %v23_v2, %v31_v10 }
  0x27   :  { %v37_v13 = vadd.f32 %v35_v12, %v23_v2  ;;  %v36_v14 = vsel %vm34_vm1, %v24_v3, %v32_v11 }
  0x28   :  { %v38_v15 = vadd.f32 %v36_v14, %v24_v3 }
  0x29   :  { %92 = vlog2.f32 %v37_v13 }
  0x2a   :  { %94 = vlog2.f32 %v38_v15 }
  0x33   :  { %v93_v18 = vpop.eup %92 }
  0x34   :  { %v95_v20 = vpop.eup %94  ;;  %v40_v21 = vmul.f32 0.6931472, %v93_v18 }
  0x35   :  { %v42_v24 = vmul.f32 0.6931472, %v95_v20 }
  0x36   :  { %v45_v25 = vsel %vm43_vm2, %v23_v2, %v40_v21 }
  0x37   :  { %v53_v27 = vcombine.high %v45_v25, %v45_v25  ;;  %v59_v28 = vor.u32 %v55_v19, %v45_v25  ;;  %v46_v29 = vsel %vm44_vm3, %v24_v3, %v42_v24 }
  0x38   :  { %v54_v30 = vcombine.high %v46_v29, %v46_v29  ;;  %v61_v31 = vor.u32 %v57_v22, %v46_v29 }
  0x39   :  { %v60_v32 = vor.u32 %v56_v23, %v53_v27 }
  0x3a   :  { %v62_v33 = vor.u32 %v58_v26, %v54_v30 }
  0x3b   :  { %v63_v34 = vcombine.low %v59_v28, %v60_v32 }
  0x3c   :  { %v64_v35 = vcombine.low %v61_v31, %v62_v33 }
  0x3d   :  { %67 = vst [vmem:[#allocation5] sm:$0xff] %v63_v34 }
  0x3e   :  { %68 = vst [vmem:[#allocation5 + $0x8] sm:$0xff] %v64_v35 }
  0x3f   :  { %129 = shalt.err (!%p126_p12)
}
  0x40   :  { %s130_s22 = scalar_lea.hbm %s181_s1, 256 }
  0x41   :  { %p131_p13 = scmp.ne.s32.totalorder %s181_s1, %s130_s22  ;;  %p134_p0 = scmp.lt.u32.totalorder %s130_s22, %s181_s1 }
  0x43   :  { %p136_p1 = pnand %p134_p0, %p131_p13 }
  0x45   :  { %139 = shalt.err (!%p136_p1)
}
  0x46   :  { %78 = dma.vmem_to_hbm [thread:$0]  %s76_s18, 256, %s181_s1, [#allocation4]  }
  0x47   :  { %142 = dma.done.wait [#allocation4], 256  }
  0x48   :  { %143 = vsyncadd [#allocation4], 4294967040 }
  0x49   :  { %82 = vsyncpa [#allocation3], 1 }
  0x4a   :  { %83 = vsyncpa [#allocation4], 1 }

</bundles_post_ra>
